<compile_context>
chip_gen: v7x
topology: tpu7x:2x2x1
jax: 0.10.0
libtpu: 0.0.40
codegen_flags: <defaults>
</compile_context>

<pallas_src>
import functools

import jax
import jax.numpy as jnp
from jax.experimental import pallas as pl
from jax.experimental.pallas import tpu as pltpu


def _conv1x1_prelu_kernel(alpha_ref, x_ref, w_ref, b_ref, o_ref):
    # alpha_ref: (1, 1) f32 SMEM        -- shared PReLU slope
    # x_ref:     (1, K, tm)    bf16     -- unshuffled activations, spatial on lanes
    # w_ref:     (C_pad, K)    bf16     -- 1x1 conv weight (zero-padded rows)
    # b_ref:     (C_pad, 1)    f32      -- bias (zero-padded)
    # o_ref:     (1, C_pad, tm) f32
    x = x_ref[0]                          # (K, tm)
    w = w_ref[...]                        # (C_pad, K)
    y = jnp.dot(w, x, preferred_element_type=jnp.float32) + b_ref[...]
    a = alpha_ref[0, 0]
    o_ref[0] = jnp.where(y > 0, y, a * y).astype(o_ref.dtype)


def conv1x1_prelu_flat(xk, w_pad, b_pad, alpha, *, tm=512):
    """xk: (N, K, M_sp) bf16; w_pad: (C_pad, K) bf16; b_pad: (C_pad, 1) f32."""
    N, K, M_sp = xk.shape
    C_pad = w_pad.shape[0]
    tm = min(tm, M_sp)                    # lane-dense spatial tile
    grid = (N, pl.cdiv(M_sp, tm))
    alpha2d = jnp.asarray(alpha, jnp.float32).reshape(1, 1)

    flops = 2 * N * M_sp * K * C_pad
    bytes_accessed = int(
        N * K * M_sp * 2                  # bf16 activations in
        + C_pad * K * 2                   # bf16 weight (resident)
        + C_pad * 4                       # f32 bias
        + N * C_pad * M_sp * 4)           # f32 output

    return pl.pallas_call(
        _conv1x1_prelu_kernel,
        out_shape=jax.ShapeDtypeStruct((N, C_pad, M_sp), jnp.float32),
        grid_spec=pltpu.PrefetchScalarGridSpec(
            num_scalar_prefetch=0,
            grid=grid,
            in_specs=[
                pl.BlockSpec(memory_space=pltpu.MemorySpace.SMEM),    # alpha
                pl.BlockSpec((1, K, tm), lambda n, j: (n, 0, j)),     # x tile
                pl.BlockSpec((C_pad, K), lambda n, j: (0, 0)),        # weight (resident)
                pl.BlockSpec((C_pad, 1), lambda n, j: (0, 0)),        # bias (resident)
            ],
            out_specs=pl.BlockSpec((1, C_pad, tm), lambda n, j: (n, 0, j)),
        ),
        compiler_params=pltpu.CompilerParams(
            dimension_semantics=("parallel", "parallel"),
            vmem_limit_bytes=32 * 1024 * 1024,
        ),
        cost_estimate=pl.CostEstimate(
            flops=flops, transcendentals=0, bytes_accessed=bytes_accessed),
    )(alpha2d, xk, w_pad, b_pad)


def pixel_unshuffle(x, scale):
    """x: (N, C, H, W) -> (N, C*scale^2, H//scale, W//scale), PyTorch semantics."""
    N, C, H, W = x.shape
    s = scale
    Hs, Ws = H // s, W // s
    x = x.reshape(N, C, Hs, s, Ws, s)
    x = jnp.transpose(x, (0, 1, 3, 5, 2, 4))     # (N, C, s, s, Hs, Ws)
    return x.reshape(N, C * s * s, Hs, Ws)


def downsample_block(x, params, scale):
    """Forward of DownsampleBlock. x: (N, C, H, W) f32 -> (N, C, H/s, W/s) f32."""
    N, C, H, W = x.shape
    s = scale
    Hs, Ws = H // s, W // s
    K = C * s * s
    M_sp = Hs * Ws
    C_out = params["conv_b"].shape[0]
    C_pad = ((max(C_out, 8) + 7) // 8) * 8

    # PixelUnshuffle fused with the bf16 cast, channels-first with flattened
    # spatial (lane) axis: (N, C, H, W) -> (N, K, Hs*Ws).  Single XLA copy.
    xk = (x.astype(jnp.bfloat16)
            .reshape(N, C, Hs, s, Ws, s)
            .transpose(0, 1, 3, 5, 2, 4)
            .reshape(N, K, M_sp))

    # Conv2d(K, C_out, 1) weight (C_out, K, 1, 1) -> (C_pad, K), rows zero-padded.
    w = params["conv_w"].reshape(C_out, K).astype(jnp.bfloat16)
    w_pad = jnp.zeros((C_pad, K), jnp.bfloat16).at[:C_out].set(w)
    b_pad = jnp.zeros((C_pad, 1), jnp.float32).at[:C_out, 0].set(
        params["conv_b"].astype(jnp.float32))

    y = conv1x1_prelu_flat(xk, w_pad, b_pad, params["prelu_a"])  # (N, C_pad, M_sp)

    # Drop the channel pad; the slice fuses with the spatial un-flatten copy.
    return y[:, :C_out, :].reshape(N, C_out, Hs, Ws)


def init_params(key, scale, input_channels):
    """Deterministic parameter init matching the module's shapes."""
    C = input_channels
    K = C * scale * scale
    k_w, k_b = jax.random.split(key)
    # Conv2d(K, C, kernel_size=1): weight (C, K, 1, 1), bias (C,)
    bound = 1.0 / jnp.sqrt(K)
    conv_w = jax.random.uniform(k_w, (C, K, 1, 1), jnp.float32, -bound, bound)
    conv_b = jax.random.uniform(k_b, (C,), jnp.float32, -bound, bound)
    # nn.PReLU() default: single shared parameter initialized to 0.25
    prelu_a = jnp.float32(0.25)
    return {"conv_w": conv_w, "conv_b": conv_b, "prelu_a": prelu_a}


if __name__ == "__main__":
    scale = 2
    input_channels = 4
    N, H, W = 2, 16, 16

    key = jax.random.PRNGKey(0)
    k_x, k_p = jax.random.split(key)
    x = jax.random.normal(k_x, (N, input_channels, H, W), jnp.float32)
    params = init_params(k_p, scale, input_channels)

    fwd = jax.jit(functools.partial(downsample_block, scale=scale))
    y = fwd(x, params)
    jax.block_until_ready(y)

    # Reference in plain JAX: same bf16-rounded inputs/weights, f32 math.
    C = input_channels
    K = C * scale * scale
    xu = pixel_unshuffle(x, scale).astype(jnp.bfloat16).astype(jnp.float32)
    wb = params["conv_w"].reshape(C, K).astype(jnp.bfloat16).astype(jnp.float32)
    yr = jnp.einsum("ok,nkhw->nohw", wb, xu) + params["conv_b"][None, :, None, None]
    yr = jnp.where(yr > 0, yr, params["prelu_a"] * yr)

    assert y.shape == (N, C, H // scale, W // scale)
    assert y.dtype == jnp.float32
    err = float(jnp.max(jnp.abs(y - yr)))
    assert jnp.allclose(y, yr, atol=1e-2, rtol=1e-2), err

    print("KERNEL_OK")
</pallas_src>

<mosaic_0001>
module attributes {stable_mosaic.version = 11 : i64} {
  func.func @_conv1x1_prelu_kernel(%arg0: i32, %arg1: i32, %arg2: memref<1x1xf32, #tpu.memory_space<smem>>, %arg3: memref<1x16x64xbf16, #tpu.memory_space<vmem>>, %arg4: memref<8x16xbf16, #tpu.memory_space<vmem>>, %arg5: memref<8x1xf32, #tpu.memory_space<vmem>>, %arg6: memref<1x8x64xf32, #tpu.memory_space<vmem>>) attributes {dimension_semantics = [#tpu.dimension_semantics<parallel>, #tpu.dimension_semantics<parallel>], iteration_bounds = array<i64: 2, 1>, scalar_prefetch = 0 : i64, scratch_operands = 0 : i64, tpu.core_type = #tpu.core_type<tc>, window_params = [{transform_indices = @transform_0, window_bounds = array<i64: 1, 1>}, {transform_indices = @transform_1, window_bounds = array<i64: 1, 16, 64>}, {pipeline_mode = #tpu.pipeline_mode<synchronous>, transform_indices = @transform_2, window_bounds = array<i64: 8, 16>}, {pipeline_mode = #tpu.pipeline_mode<synchronous>, transform_indices = @transform_3, window_bounds = array<i64: 8, 1>}, {transform_indices = @transform_4, window_bounds = array<i64: 1, 8, 64>}]} {
    %c0 = arith.constant 0 : index
    %c0_0 = arith.constant 0 : index
    %c0_1 = arith.constant 0 : index
    %0 = vector.load %arg3[%c0, %c0_0, %c0_1] : memref<1x16x64xbf16, #tpu.memory_space<vmem>>, vector<1x16x64xbf16>
    %1 = vector.shape_cast %0 : vector<1x16x64xbf16> to vector<16x64xbf16>
    %c0_2 = arith.constant 0 : index
    %c0_3 = arith.constant 0 : index
    %2 = vector.load %arg4[%c0_2, %c0_3] : memref<8x16xbf16, #tpu.memory_space<vmem>>, vector<8x16xbf16>
    %cst = arith.constant dense<0.000000e+00> : vector<8x64xf32>
    %3 = tpu.matmul %2, %1, %cst {dimension_numbers = #tpu.dot_dimension_numbers<[1], [0], [0], [1], [0, 0, 1, 1], [], []>} : vector<8x16xbf16>, vector<16x64xbf16>, vector<8x64xf32> -> vector<8x64xf32>
    %c0_4 = arith.constant 0 : index
    %c0_5 = arith.constant 0 : index
    %4 = vector.load %arg5[%c0_4, %c0_5] : memref<8x1xf32, #tpu.memory_space<vmem>>, vector<8x1xf32>
    %5 = vector.broadcast %4 : vector<8x1xf32> to vector<8x64xf32>
    %6 = arith.addf %3, %5 : vector<8x64xf32>
    %c0_6 = arith.constant 0 : index
    %c0_7 = arith.constant 0 : index
    %7 = memref.load %arg2[%c0_6, %c0_7] : memref<1x1xf32, #tpu.memory_space<smem>>
    %cst_8 = arith.constant 0.000000e+00 : f32
    %8 = vector.broadcast %cst_8 : f32 to vector<8x64xf32>
    %9 = arith.cmpf ogt, %6, %8 : vector<8x64xf32>
    %10 = vector.broadcast %7 : f32 to vector<8x64xf32>
    %11 = arith.mulf %10, %6 : vector<8x64xf32>
    %12 = arith.select %9, %6, %11 : vector<8x64xi1>, vector<8x64xf32>
    %c0_9 = arith.constant 0 : index
    %c0_10 = arith.constant 0 : index
    %c0_11 = arith.constant 0 : index
    %13 = vector.load %arg6[%c0_9, %c0_10, %c0_11] : memref<1x8x64xf32, #tpu.memory_space<vmem>>, vector<1x8x64xf32>
    %14 = vector.shape_cast %13 : vector<1x8x64xf32> to vector<8x64xf32>
    %15 = vector.shape_cast %12 : vector<8x64xf32> to vector<1x8x64xf32>
    tpu.vector_store %arg6[%c0_9, %c0_10, %c0_11], %15 {strides = array<i32>} : memref<1x8x64xf32, #tpu.memory_space<vmem>>, vector<1x8x64xf32>,
    return
  }
  func.func @transform_0(%arg0: i32, %arg1: i32) -> (i32, i32) {
    %c0_i32 = arith.constant 0 : i32
    %c0_i32_0 = arith.constant 0 : i32
    %c0_i32_1 = arith.constant 0 : i32
    return %c0_i32, %c0_i32_0 : i32, i32
  }
  func.func @transform_1(%arg0: i32, %arg1: i32) -> (i32, i32, i32) {
    %c0_i32 = arith.constant 0 : i32
    %c0_i32_0 = arith.constant 0 : i32
    return %arg0, %c0_i32, %arg1 : i32, i32, i32
  }
  func.func @transform_2(%arg0: i32, %arg1: i32) -> (i32, i32) {
    %c0_i32 = arith.constant 0 : i32
    %c0_i32_0 = arith.constant 0 : i32
    %c0_i32_1 = arith.constant 0 : i32
    return %c0_i32, %c0_i32_0 : i32, i32
  }
  func.func @transform_3(%arg0: i32, %arg1: i32) -> (i32, i32) {
    %c0_i32 = arith.constant 0 : i32
    %c0_i32_0 = arith.constant 0 : i32
    %c0_i32_1 = arith.constant 0 : i32
    return %c0_i32, %c0_i32_0 : i32, i32
  }
  func.func @transform_4(%arg0: i32, %arg1: i32) -> (i32, i32, i32) {
    %c0_i32 = arith.constant 0 : i32
    %c0_i32_0 = arith.constant 0 : i32
    return %arg0, %c0_i32, %arg1 : i32, i32, i32
  }
}

</mosaic_0001>

<bundles_post_ra>
// kernel: downsample_block.1
= control target key start
LH: loop header
LB: loop body
LE: loop exit
PB: predicated region body
PF: predicated region fallthrough
CT: control target
= control target key end

     0   :  { %s477_s17 = smov 0   ;;  %s479_s18 = smov 0   ;;  %s516_s0 = inlined_call_operand.<no memory space> [shape: f32[1,1], index: 0, kind: input, shape index: {}]   ;;  %s517_s1 = inlined_call_operand.vmem [shape: bf16[2,16,64], index: 1, kind: input, shape index: {}]   ;;  %s518_s2 = inlined_call_operand.vmem [shape: bf16[8,16], index: 2, kind: input, shape index: {}]   ;;  %s519_s3 = inlined_call_operand.vmem [shape: f32[8,1], index: 3, kind: input, shape index: {}]   ;;  %s520_s4 = inlined_call_operand.vmem [shape: f32[2,8,64], index: 4, kind: output, shape index: {}]  }
   0x1   :  { %9 = sst [smem:[#allocation2]] %s516_s0  ;;  %s481_s19 = smov 0  }
   0x2 LB: > { %s27_s0 = sadd.s32 1, %s440_s18  ;;  %p376_p0 = scmp.ge.s32.totalorder %s444_s19, 1  ;;  %s444_s19 = sphi %s481_s19, %s15_s19   ;;  %s440_s18 = sphi %s479_s18, %s522_s18   ;;  %s436_s17 = sphi %s477_s17, %s521_s17  }
   0x3   : > { %p29_p1 = scmp.ge.s32.totalorder %s27_s0, 2  ;;  %p182_p2 = scmp.lt.s32.totalorder %s444_s19, 3 }
   0x5   : > { %s524_s0 = smov (%p29_p1, %s27_s0), 0  ;;  %p183_p3 = pnand %p376_p0, %p182_p2 }
   0x6   : > { %p213_p4 = scmp.lt.s32.totalorder (!%p183_p3), %s436_s17, 1  ;;  %v446_v0 = vmov (!%p183_p3), 0.0   ;;  %vm447_vm0 = vmmov (!%p183_p3), 0   ;;  %v232_v1 = vld [vmem:[%s519_s3] sm:$0xff] (!%p183_p3)  ;;  %v448_v2 = vmov (!%p183_p3), 0   ;;  %vm244_vm1 = vcmask (!%p183_p3), 130048  }
   0x7   : > { %186 = sbr.rel (%p183_p3) target bundleno = 239 (0xef), region = 36  ;;  %387 = vmatprep.subr.bf16.mxu0 (!%p183_p3), %v446_v0  ;;  %389 = vmatprep.mubr.msk.bf16.mxu0 (!%p183_p3), %vm447_vm0, %v446_v0  ;;  %v231_v4 = vld [vmem:[%s518_s2] sm:$0xf] (!%p183_p3)  ;;  %s288_s28 = sld [smem:[#allocation2]] (!%p183_p3)  ;;  %vm293_vm3 = vcmask (!%p183_p3), 523264  }
   0x8   : > { %420 = vset.pattern.permute.xlu0 (!%p183_p3), %v448_v2 }
   0x9   : > { %235 = vperm.xlu0 (!%p183_p3), %420, %v232_v1  }
   0xd   : > { %v290_v7 = vstv (!%p183_p3), %s288_s28 }
   0xe   : > { %s526_s17 = smov (!%p213_p4, %s436_s17), 1 }
   0xf   : > { %s384_s22 = sshll.u32 %s526_s17, 3 }
  0x10   : > { %s220_s25 = scalar_lea.vmem %s517_s1, %s384_s22  ;;  %s227_s5 = scalar_lea.vmem %s520_s4, %s384_s22 }
  0x11   : > { %v421_v3 = vld [vmem:[%s220_s25] sm:$0xff]  }
  0x12   : > { %388 = vmatpush3.bf16.msra.mxu0 %v421_v3 }
  0x15   : > { %390 = vmatmul.mubr.msk.bf16.vlgmr.msra.gmra.mrb[0].mxu0 %vm244_vm1, %v231_v4 }
  0x88   : > { %v236_v5 = vpop.permute.xlu0 %235 }
  0xe8   : > { %v282_v6 = vpop.f32.mrb[0].mxu0 }
  0xe9   : > { %v283_v8 = vadd.f32 %v282_v6, %v236_v5  ;;  %v391_v9 = vpop.f32.mrb[1].mxu0 }
  0xea   : > { %v285_v10 = vpop.f32.mrb[2].mxu0 }
  0xeb   : > { %vm289_vm2 = vcmp.gt.f32.partialorder %v283_v8, 0.0  ;;  %v291_v11 = vmul.f32 %v290_v7, %v283_v8  ;;  %v392_v12 = vpop.f32.mrb[3].mxu0 }
  0xed   : > { %v292_v13 = vsel %vm289_vm2, %v283_v8, %v291_v11 }
  0xee   : > { %294 = vst.msk [vmem:[%s227_s5] sm:$0xff] %vm293_vm3, %v292_v13 }
  0xef PF: > { %s15_s19 = sadd.s32 1, %s444_s19   ;;  %s521_s17 = smov %s440_s18 }
  0xf0   : > { %p12_p5 = scmp.ge.s32.totalorder %s15_s19, 4   ;;  %s522_s18 = smov %s524_s0 }
  0xf2   :  { %14 = sbr.rel (!%p12_p5) target bundleno = 2 (0x2), region = 66 }

</bundles_post_ra>
